<compile_context>
chip_gen: v5e
topology: v5e:2x2
jax: 0.10.0
libtpu: 0.0.40
codegen_flags: <defaults>
</compile_context>

<pallas_src>
import functools

import jax
import jax.numpy as jnp
from jax.experimental import pallas as pl
from jax.experimental.pallas import tpu as pltpu


# -----------------------------------------------------------------------------
# Stage 1: fused qkv projection, pos MLP, VPU pairwise distances, top-K (min),
# packed ev = [q-k+rpe || v+rpe] output.  Row-tiled: VMEM is O(TM*N), not O(N^2).
# -----------------------------------------------------------------------------
def _stage1_kernel(x_ref, posr_ref, post_ref, wqkv_ref,
                   pw1_ref, pb1_ref, pw2_ref, pb2_ref,
                   ev_ref, idx_ref, *, num_neighbors, dim_out):
    D = dim_out
    x = x_ref[0]                 # (TM, Din)
    pr = posr_ref[0]             # (TM, 3)   row tile of pos
    pt = post_ref[0]             # (3, N)    full transposed pos
    n = pt.shape[1]

    # fused qkv: single MXU push with a 3*D-wide output
    qkv = jnp.dot(x, wqkv_ref[...], preferred_element_type=jnp.float32)
    q = qkv[:, :D]
    k = qkv[:, D:2 * D]
    v = qkv[:, 2 * D:]

    # pos_mlp: Linear(3,H) -> ReLU -> Linear(H,D)
    h = jnp.maximum(
        jnp.dot(pr, pw1_ref[...], preferred_element_type=jnp.float32)
        + pb1_ref[...], 0.0)
    rpe = (jnp.dot(h, pw2_ref[...], preferred_element_type=jnp.float32)
           + pb2_ref[...])

    # lane-packed slab: [q - k + rpe || v + rpe]   (TM, 2D)  -> one dense store
    ev_ref[0] = jnp.concatenate([(q - k) + rpe, v + rpe], axis=1)

    # pairwise squared distances on the VPU (contraction depth is only 3,
    # so broadcast multiply-adds beat an MXU push)
    inner = (pr[:, 0:1] * pt[0:1, :]
             + pr[:, 1:2] * pt[1:2, :]
             + pr[:, 2:3] * pt[2:3, :])                               # (TM, N)
    quad_row = pt[0:1, :] ** 2 + pt[1:2, :] ** 2 + pt[2:3, :] ** 2    # (1, N)
    quad_col = pr[:, 0:1] ** 2 + pr[:, 1:2] ** 2 + pr[:, 2:3] ** 2    # (TM, 1)
    rel_dist = -2.0 * inner + quad_col + quad_row                     # (TM, N)

    # top-K smallest via iterative selection (K small & static); ties pick the
    # lowest column index (matches jax.lax.top_k for exact ties).
    iota = jax.lax.broadcasted_iota(jnp.int32, rel_dist.shape, 1)
    d = rel_dist
    cols = []
    for _ in range(num_neighbors):
        m = jnp.min(d, axis=1, keepdims=True)                              # (TM, 1)
        sel = jnp.min(jnp.where(d == m, iota, n), axis=1, keepdims=True)   # (TM, 1)
        cols.append(sel)
        d = jnp.where(iota == sel, jnp.inf, d)
    idx_ref[0] = jnp.concatenate(cols, axis=1)                             # (TM, K)


# -----------------------------------------------------------------------------
# Stage 2: attn MLP on neighbour-flattened rows, softmax over neighbours,
# weighted aggregation.  Gathered input is neighbour-major (1, K, TM, 2D) so
# every per-neighbour slice is a contiguous full tile.
# -----------------------------------------------------------------------------
def _stage2_kernel(g_ref, aw1_ref, ab1_ref, aw2_ref, ab2_ref, out_ref,
                   *, num_neighbors, dim_out):
    K = num_neighbors
    D = dim_out
    tm = g_ref.shape[2]
    g = g_ref[0]                                                     # (K, TM, 2D)

    # attn MLP with the neighbour axis folded into the row axis:
    # 2 large matmuls instead of 2*K tiny ones.
    e_flat = jnp.concatenate([g[j, :, :D] for j in range(K)], axis=0)  # (K*TM, D)
    hid = jnp.maximum(
        jnp.dot(e_flat, aw1_ref[...], preferred_element_type=jnp.float32)
        + ab1_ref[...], 0.0)
    sim_flat = (jnp.dot(hid, aw2_ref[...], preferred_element_type=jnp.float32)
                + ab2_ref[...])                                        # (K*TM, D)

    sims = [sim_flat[j * tm:(j + 1) * tm, :] for j in range(K)]        # K x (TM, D)

    # softmax over the neighbour axis (dim=-2 of the PyTorch code)
    m = sims[0]
    for j in range(1, K):
        m = jnp.maximum(m, sims[j])
    exps = [jnp.exp(s - m) for s in sims]
    denom = exps[0]
    for j in range(1, K):
        denom = denom + exps[j]
    inv = 1.0 / denom

    acc = exps[0] * g[0, :, D:]
    for j in range(1, K):
        acc = acc + exps[j] * g[j, :, D:]
    out_ref[0] = acc * inv


# -----------------------------------------------------------------------------
# Wrapper
# -----------------------------------------------------------------------------
def _pick_tile(n, requested=None):
    if requested is not None:
        if n % requested != 0:
            raise ValueError(f"tile {requested} must divide N={n}")
        return requested
    for cand in (256, 128, 64, 32, 16, 8):
        if n % cand == 0:
            return cand
    return n  # fall back: full rows (allowed via the full-dim rule)


def _compiler_params(est_bytes):
    # Only raise the scoped VMEM limit when the tile footprint needs it;
    # cap conservatively so the same code also fits v7x's 64 MiB physical VMEM.
    limit = None
    need = int(est_bytes * 1.5)
    if need > 32 * 1024 * 1024:
        limit = min(need, 48 * 1024 * 1024)
    return pltpu.CompilerParams(
        dimension_semantics=("parallel", "parallel"),
        vmem_limit_bytes=limit)


def point_transformer_layer(x, pos, params, num_neighbors, tm=None):
    B, N, Din = x.shape
    D = params["pw2"].shape[1]
    H = params["pw1"].shape[1]
    Ha = params["aw1"].shape[1]
    K = num_neighbors
    TM = _pick_tile(N, tm)
    NT = N // TM

    pos_t = jnp.swapaxes(pos, 1, 2)  # (B, 3, N)

    s1_est = 4 * (2 * (TM * Din + 3 * TM + 3 * N + 2 * TM * D + TM * K)
                  + (Din * 3 * D + 3 * H + H + H * D + D)
                  + 6 * TM * N)
    stage1 = pl.pallas_call(
        functools.partial(_stage1_kernel, num_neighbors=K, dim_out=D),
        out_shape=(
            jax.ShapeDtypeStruct((B, N, 2 * D), jnp.float32),
            jax.ShapeDtypeStruct((B, N, K), jnp.int32),
        ),
        grid=(B, NT),
        in_specs=[
            pl.BlockSpec((1, TM, Din), lambda b, i: (b, i, 0)),
            pl.BlockSpec((1, TM, 3), lambda b, i: (b, i, 0)),
            pl.BlockSpec((1, 3, N), lambda b, i: (b, 0, 0)),
            pl.BlockSpec((Din, 3 * D), lambda b, i: (0, 0)),
            pl.BlockSpec((3, H), lambda b, i: (0, 0)),
            pl.BlockSpec((1, H), lambda b, i: (0, 0)),
            pl.BlockSpec((H, D), lambda b, i: (0, 0)),
            pl.BlockSpec((1, D), lambda b, i: (0, 0)),
        ],
        out_specs=(
            pl.BlockSpec((1, TM, 2 * D), lambda b, i: (b, i, 0)),
            pl.BlockSpec((1, TM, K), lambda b, i: (b, i, 0)),
        ),
        compiler_params=_compiler_params(s1_est),
    )
    ev, idx = stage1(x, pos, pos_t, params["w_qkv"],
                     params["pw1"], params["pb1"], params["pw2"], params["pb2"])

    # Single neighbour-major gather of the packed slab:
    #   g[b, j, n, :] = ev[b, idx[b, n, j], :]        -> (B, K, N, 2D)
    # (half the HBM round-trip of gathering q,k,v,rpe separately, and stage-2
    #  per-neighbour slices become contiguous full tiles)
    g = jax.vmap(lambda vb, ib: vb[ib])(ev, jnp.swapaxes(idx, 1, 2))

    s2_est = 4 * (2 * (2 * K * TM * D + TM * D)
                  + (D * Ha + Ha + Ha * D + D)
                  + 6 * K * TM * D)
    stage2 = pl.pallas_call(
        functools.partial(_stage2_kernel, num_neighbors=K, dim_out=D),
        out_shape=jax.ShapeDtypeStruct((B, N, D), jnp.float32),
        grid=(B, NT),
        in_specs=[
            pl.BlockSpec((1, K, TM, 2 * D), lambda b, i: (b, 0, i, 0)),
            pl.BlockSpec((D, Ha), lambda b, i: (0, 0)),
            pl.BlockSpec((1, Ha), lambda b, i: (0, 0)),
            pl.BlockSpec((Ha, D), lambda b, i: (0, 0)),
            pl.BlockSpec((1, D), lambda b, i: (0, 0)),
        ],
        out_specs=pl.BlockSpec((1, TM, D), lambda b, i: (b, i, 0)),
        compiler_params=_compiler_params(s2_est),
    )
    return stage2(g, params["aw1"], params["ab1"], params["aw2"], params["ab2"])


# -----------------------------------------------------------------------------
# Pure-JAX reference (mirrors the PyTorch forward, mask=None, kNN path)
# -----------------------------------------------------------------------------
def _gather_points(vals, idx):
    # vals: (B, N, C), idx: (B, N, K) -> (B, N, K, C)  (== utils.index_points)
    return jax.vmap(lambda vb, ib: vb[ib])(vals, idx)


def reference_forward(x, pos, params, num_neighbors):
    D = params["pw2"].shape[1]
    qkv = x @ params["w_qkv"]
    q, k, v = qkv[..., :D], qkv[..., D:2 * D], qkv[..., 2 * D:]
    rpe = jnp.maximum(pos @ params["pw1"] + params["pb1"], 0.0) @ params["pw2"] \
        + params["pb2"]
    inner = jnp.einsum("bnd,bmd->bnm", pos, pos)
    quad = jnp.sum(pos ** 2, axis=2)
    rel_dist = -2.0 * inner + quad[:, None, :] + quad[:, :, None]
    _, idx = jax.lax.top_k(-rel_dist, num_neighbors)
    qg, kg, vg, rg = (_gather_points(t, idx) for t in (q, k, v, rpe))
    vv = vg + rg
    e = qg - kg + rg
    hid = jnp.maximum(jnp.einsum("bnkd,dh->bnkh", e, params["aw1"])
                      + params["ab1"], 0.0)
    sim = jnp.einsum("bnkh,hd->bnkd", hid, params["aw2"]) + params["ab2"]
    attn = jax.nn.softmax(sim, axis=-2)
    return jnp.sum(attn * vv, axis=-2)


# -----------------------------------------------------------------------------
# Deterministic parameter init + demo
# -----------------------------------------------------------------------------
def _lin_w(key, fan_in, fan_out):
    bound = 1.0 / (fan_in ** 0.5)
    return jax.random.uniform(key, (fan_in, fan_out), jnp.float32, -bound, bound)


def _lin_b(key, fan_in, fan_out):
    bound = 1.0 / (fan_in ** 0.5)
    return jax.random.uniform(key, (1, fan_out), jnp.float32, -bound, bound)


if __name__ == "__main__":
    B, N = 2, 16
    DIM_IN, DIM_OUT = 8, 16
    POS_HIDDEN = 32
    ATTN_MULT = 4
    NUM_NEIGHBORS = 4

    key = jax.random.PRNGKey(0)
    ks = jax.random.split(key, 12)

    params = {
        "w_qkv": _lin_w(ks[0], DIM_IN, 3 * DIM_OUT),        # cols [q | k | v]
        "pw1": _lin_w(ks[1], 3, POS_HIDDEN),
        "pb1": _lin_b(ks[2], 3, POS_HIDDEN),
        "pw2": _lin_w(ks[3], POS_HIDDEN, DIM_OUT),
        "pb2": _lin_b(ks[4], POS_HIDDEN, DIM_OUT),
        "aw1": _lin_w(ks[5], DIM_OUT, DIM_OUT * ATTN_MULT),
        "ab1": _lin_b(ks[6], DIM_OUT, DIM_OUT * ATTN_MULT),
        "aw2": _lin_w(ks[7], DIM_OUT * ATTN_MULT, DIM_OUT),
        "ab2": _lin_b(ks[8], DIM_OUT * ATTN_MULT, DIM_OUT),
    }

    x = jax.random.normal(ks[9], (B, N, DIM_IN), jnp.float32)
    pos = jax.random.normal(ks[10], (B, N, 3), jnp.float32)

    # tm=8 exercises the row-tiled path (grid = (B, N//8) = (2, 2))
    out = point_transformer_layer(x, pos, params, NUM_NEIGHBORS, tm=8)
    out = jax.block_until_ready(out)

    ref = reference_forward(x, pos, params, NUM_NEIGHBORS)
    assert out.shape == (B, N, DIM_OUT)
    err = float(jnp.max(jnp.abs(out - ref)))
    assert jnp.allclose(out, ref, atol=2e-4, rtol=2e-4), (
        f"mismatch vs reference: max abs err = {err}")

    print("KERNEL_OK")
</pallas_src>

<mosaic_0001>
module attributes {stable_mosaic.version = 11 : i64} {
  func.func @_stage1_kernel(%arg0: i32, %arg1: i32, %arg2: memref<1x8x8xf32, #tpu.memory_space<vmem>>, %arg3: memref<1x8x3xf32, #tpu.memory_space<vmem>>, %arg4: memref<1x3x16xf32, #tpu.memory_space<vmem>>, %arg5: memref<8x48xf32, #tpu.memory_space<vmem>>, %arg6: memref<3x32xf32, #tpu.memory_space<vmem>>, %arg7: memref<1x32xf32, #tpu.memory_space<vmem>>, %arg8: memref<32x16xf32, #tpu.memory_space<vmem>>, %arg9: memref<1x16xf32, #tpu.memory_space<vmem>>, %arg10: memref<1x8x32xf32, #tpu.memory_space<vmem>>, %arg11: memref<1x8x4xi32, #tpu.memory_space<vmem>>) attributes {dimension_semantics = [#tpu.dimension_semantics<parallel>, #tpu.dimension_semantics<parallel>], iteration_bounds = array<i64: 2, 2>, scalar_prefetch = 0 : i64, scratch_operands = 0 : i64, tpu.core_type = #tpu.core_type<tc>, window_params = [{transform_indices = @transform_0, window_bounds = array<i64: 1, 8, 8>}, {transform_indices = @transform_1, window_bounds = array<i64: 1, 8, 3>}, {transform_indices = @transform_2, window_bounds = array<i64: 1, 3, 16>}, {pipeline_mode = #tpu.pipeline_mode<synchronous>, transform_indices = @transform_3, window_bounds = array<i64: 8, 48>}, {pipeline_mode = #tpu.pipeline_mode<synchronous>, transform_indices = @transform_4, window_bounds = array<i64: 3, 32>}, {pipeline_mode = #tpu.pipeline_mode<synchronous>, transform_indices = @transform_5, window_bounds = array<i64: 1, 32>}, {pipeline_mode = #tpu.pipeline_mode<synchronous>, transform_indices = @transform_6, window_bounds = array<i64: 32, 16>}, {pipeline_mode = #tpu.pipeline_mode<synchronous>, transform_indices = @transform_7, window_bounds = array<i64: 1, 16>}, {transform_indices = @transform_8, window_bounds = array<i64: 1, 8, 32>}, {transform_indices = @transform_9, window_bounds = array<i64: 1, 8, 4>}]} {
    %c0 = arith.constant 0 : index
    %c0_0 = arith.constant 0 : index
    %c0_1 = arith.constant 0 : index
    %0 = vector.load %arg2[%c0, %c0_0, %c0_1] : memref<1x8x8xf32, #tpu.memory_space<vmem>>, vector<1x8x8xf32>
    %1 = vector.shape_cast %0 : vector<1x8x8xf32> to vector<8x8xf32>
    %c0_2 = arith.constant 0 : index
    %c0_3 = arith.constant 0 : index
    %c0_4 = arith.constant 0 : index
    %2 = vector.load %arg3[%c0_2, %c0_3, %c0_4] : memref<1x8x3xf32, #tpu.memory_space<vmem>>, vector<1x8x3xf32>
    %3 = vector.shape_cast %2 : vector<1x8x3xf32> to vector<8x3xf32>
    %c0_5 = arith.constant 0 : index
    %c0_6 = arith.constant 0 : index
    %c0_7 = arith.constant 0 : index
    %4 = vector.load %arg4[%c0_5, %c0_6, %c0_7] : memref<1x3x16xf32, #tpu.memory_space<vmem>>, vector<1x3x16xf32>
    %5 = vector.shape_cast %4 : vector<1x3x16xf32> to vector<3x16xf32>
    %c0_8 = arith.constant 0 : index
    %c0_9 = arith.constant 0 : index
    %6 = vector.load %arg5[%c0_8, %c0_9] : memref<8x48xf32, #tpu.memory_space<vmem>>, vector<8x48xf32>
    %cst = arith.constant dense<0.000000e+00> : vector<8x48xf32>
    %7 = tpu.matmul %1, %6, %cst {dimension_numbers = #tpu.dot_dimension_numbers<[1], [0], [0], [1], [0, 0, 1, 1], [], []>} : vector<8x8xf32>, vector<8x48xf32>, vector<8x48xf32> -> vector<8x48xf32>
    %8 = vector.extract_strided_slice %7 {offsets = [0, 0], sizes = [8, 16], strides = [1, 1]} : vector<8x48xf32> to vector<8x16xf32>
    %9 = vector.extract_strided_slice %7 {offsets = [0, 16], sizes = [8, 16], strides = [1, 1]} : vector<8x48xf32> to vector<8x16xf32>
    %10 = vector.extract_strided_slice %7 {offsets = [0, 32], sizes = [8, 16], strides = [1, 1]} : vector<8x48xf32> to vector<8x16xf32>
    %c0_10 = arith.constant 0 : index
    %c0_11 = arith.constant 0 : index
    %11 = vector.load %arg6[%c0_10, %c0_11] : memref<3x32xf32, #tpu.memory_space<vmem>>, vector<3x32xf32>
    %cst_12 = arith.constant dense<0.000000e+00> : vector<8x32xf32>
    %12 = tpu.matmul %3, %11, %cst_12 {dimension_numbers = #tpu.dot_dimension_numbers<[1], [0], [0], [1], [0, 0, 1, 1], [], []>} : vector<8x3xf32>, vector<3x32xf32>, vector<8x32xf32> -> vector<8x32xf32>
    %c0_13 = arith.constant 0 : index
    %c0_14 = arith.constant 0 : index
    %13 = vector.load %arg7[%c0_13, %c0_14] : memref<1x32xf32, #tpu.memory_space<vmem>>, vector<1x32xf32>
    %14 = vector.broadcast %13 : vector<1x32xf32> to vector<8x32xf32>
    %15 = arith.addf %12, %14 : vector<8x32xf32>
    %cst_15 = arith.constant 0.000000e+00 : f32
    %16 = vector.broadcast %cst_15 : f32 to vector<8x32xf32>
    %17 = arith.maximumf %15, %16 : vector<8x32xf32>
    %c0_16 = arith.constant 0 : index
    %c0_17 = arith.constant 0 : index
    %18 = vector.load %arg8[%c0_16, %c0_17] : memref<32x16xf32, #tpu.memory_space<vmem>>, vector<32x16xf32>
    %cst_18 = arith.constant dense<0.000000e+00> : vector<8x16xf32>
    %19 = tpu.matmul %17, %18, %cst_18 {dimension_numbers = #tpu.dot_dimension_numbers<[1], [0], [0], [1], [0, 0, 1, 1], [], []>} : vector<8x32xf32>, vector<32x16xf32>, vector<8x16xf32> -> vector<8x16xf32>
    %c0_19 = arith.constant 0 : index
    %c0_20 = arith.constant 0 : index
    %20 = vector.load %arg9[%c0_19, %c0_20] : memref<1x16xf32, #tpu.memory_space<vmem>>, vector<1x16xf32>
    %21 = vector.broadcast %20 : vector<1x16xf32> to vector<8x16xf32>
    %22 = arith.addf %19, %21 : vector<8x16xf32>
    %23 = arith.subf %8, %9 : vector<8x16xf32>
    %24 = arith.addf %23, %22 : vector<8x16xf32>
    %25 = arith.addf %10, %22 : vector<8x16xf32>
    %26 = tpu.concatenate %24, %25 in 1 : vector<8x16xf32>, vector<8x16xf32> -> vector<8x32xf32>
    %c0_21 = arith.constant 0 : index
    %c0_22 = arith.constant 0 : index
    %c0_23 = arith.constant 0 : index
    %27 = vector.load %arg10[%c0_21, %c0_22, %c0_23] : memref<1x8x32xf32, #tpu.memory_space<vmem>>, vector<1x8x32xf32>
    %28 = vector.shape_cast %27 : vector<1x8x32xf32> to vector<8x32xf32>
    %29 = vector.shape_cast %26 : vector<8x32xf32> to vector<1x8x32xf32>
    tpu.vector_store %arg10[%c0_21, %c0_22, %c0_23], %29 {strides = array<i32>} : memref<1x8x32xf32, #tpu.memory_space<vmem>>, vector<1x8x32xf32>,
    %30 = vector.extract_strided_slice %3 {offsets = [0, 0], sizes = [8, 1], strides = [1, 1]} : vector<8x3xf32> to vector<8x1xf32>
    %31 = vector.extract_strided_slice %5 {offsets = [0, 0], sizes = [1, 16], strides = [1, 1]} : vector<3x16xf32> to vector<1x16xf32>
    %32 = vector.broadcast %30 : vector<8x1xf32> to vector<8x16xf32>
    %33 = vector.broadcast %31 : vector<1x16xf32> to vector<8x16xf32>
    %34 = arith.mulf %32, %33 : vector<8x16xf32>
    %35 = vector.extract_strided_slice %3 {offsets = [0, 1], sizes = [8, 1], strides = [1, 1]} : vector<8x3xf32> to vector<8x1xf32>
    %36 = vector.extract_strided_slice %5 {offsets = [1, 0], sizes = [1, 16], strides = [1, 1]} : vector<3x16xf32> to vector<1x16xf32>
    %37 = vector.broadcast %35 : vector<8x1xf32> to vector<8x16xf32>
    %38 = vector.broadcast %36 : vector<1x16xf32> to vector<8x16xf32>
    %39 = arith.mulf %37, %38 : vector<8x16xf32>
    %40 = arith.addf %34, %39 : vector<8x16xf32>
    %41 = vector.extract_strided_slice %3 {offsets = [0, 2], sizes = [8, 1], strides = [1, 1]} : vector<8x3xf32> to vector<8x1xf32>
    %42 = vector.extract_strided_slice %5 {offsets = [2, 0], sizes = [1, 16], strides = [1, 1]} : vector<3x16xf32> to vector<1x16xf32>
    %43 = vector.broadcast %41 : vector<8x1xf32> to vector<8x16xf32>
    %44 = vector.broadcast %42 : vector<1x16xf32> to vector<8x16xf32>
    %45 = arith.mulf %43, %44 : vector<8x16xf32>
    %46 = arith.addf %40, %45 : vector<8x16xf32>
    %47 = vector.extract_strided_slice %5 {offsets = [0, 0], sizes = [1, 16], strides = [1, 1]} : vector<3x16xf32> to vector<1x16xf32>
    %48 = arith.mulf %47, %47 : vector<1x16xf32>
    %49 = vector.extract_strided_slice %5 {offsets = [1, 0], sizes = [1, 16], strides = [1, 1]} : vector<3x16xf32> to vector<1x16xf32>
    %50 = arith.mulf %49, %49 : vector<1x16xf32>
    %51 = arith.addf %48, %50 : vector<1x16xf32>
    %52 = vector.extract_strided_slice %5 {offsets = [2, 0], sizes = [1, 16], strides = [1, 1]} : vector<3x16xf32> to vector<1x16xf32>
    %53 = arith.mulf %52, %52 : vector<1x16xf32>
    %54 = arith.addf %51, %53 : vector<1x16xf32>
    %55 = vector.extract_strided_slice %3 {offsets = [0, 0], sizes = [8, 1], strides = [1, 1]} : vector<8x3xf32> to vector<8x1xf32>
    %56 = arith.mulf %55, %55 : vector<8x1xf32>
    %57 = vector.extract_strided_slice %3 {offsets = [0, 1], sizes = [8, 1], strides = [1, 1]} : vector<8x3xf32> to vector<8x1xf32>
    %58 = arith.mulf %57, %57 : vector<8x1xf32>
    %59 = arith.addf %56, %58 : vector<8x1xf32>
    %60 = vector.extract_strided_slice %3 {offsets = [0, 2], sizes = [8, 1], strides = [1, 1]} : vector<8x3xf32> to vector<8x1xf32>
    %61 = arith.mulf %60, %60 : vector<8x1xf32>
    %62 = arith.addf %59, %61 : vector<8x1xf32>
    %cst_24 = arith.constant -2.000000e+00 : f32
    %63 = vector.broadcast %cst_24 : f32 to vector<8x16xf32>
    %64 = arith.mulf %63, %46 : vector<8x16xf32>
    %65 = vector.broadcast %62 : vector<8x1xf32> to vector<8x16xf32>
    %66 = arith.addf %64, %65 : vector<8x16xf32>
    %67 = vector.broadcast %54 : vector<1x16xf32> to vector<8x16xf32>
    %68 = arith.addf %66, %67 : vector<8x16xf32>
    %69 = tpu.iota {dimensions = array<i32: 1>} : vector<8x16xi32>
    %cst_25 = arith.constant dense<0x7F800000> : vector<8xf32>
    %70 = vector.multi_reduction <minimumf>, %68, %cst_25 [1] : vector<8x16xf32> to vector<8xf32>
    %71 = vector.shape_cast %70 : vector<8xf32> to vector<8x1xf32>
    %72 = vector.broadcast %71 : vector<8x1xf32> to vector<8x16xf32>
    %73 = arith.cmpf oeq, %68, %72 : vector<8x16xf32>
    %c16_i32 = arith.constant 16 : i32
    %74 = vector.broadcast %c16_i32 : i32 to vector<8x16xi32>
    %75 = arith.select %73, %69, %74 : vector<8x16xi1>, vector<8x16xi32>
    %cst_26 = arith.constant dense<2147483647> : vector<8xi32>
    %76 = vector.multi_reduction <minsi>, %75, %cst_26 [1] : vector<8x16xi32> to vector<8xi32>
    %77 = vector.shape_cast %76 : vector<8xi32> to vector<8x1xi32>
    %78 = vector.broadcast %77 : vector<8x1xi32> to vector<8x16xi32>
    %79 = arith.cmpi eq, %69, %78 : vector<8x16xi32>
    %cst_27 = arith.constant 0x7F800000 : f32
    %80 = vector.broadcast %cst_27 : f32 to vector<8x16xf32>
    %81 = arith.select %79, %80, %68 : vector<8x16xi1>, vector<8x16xf32>
    %cst_28 = arith.constant dense<0x7F800000> : vector<8xf32>
    %82 = vector.multi_reduction <minimumf>, %81, %cst_28 [1] : vector<8x16xf32> to vector<8xf32>
    %83 = vector.shape_cast %82 : vector<8xf32> to vector<8x1xf32>
    %84 = vector.broadcast %83 : vector<8x1xf32> to vector<8x16xf32>
    %85 = arith.cmpf oeq, %81, %84 : vector<8x16xf32>
    %c16_i32_29 = arith.constant 16 : i32
    %86 = vector.broadcast %c16_i32_29 : i32 to vector<8x16xi32>
    %87 = arith.select %85, %69, %86 : vector<8x16xi1>, vector<8x16xi32>
    %cst_30 = arith.constant dense<2147483647> : vector<8xi32>
    %88 = vector.multi_reduction <minsi>, %87, %cst_30 [1] : vector<8x16xi32> to vector<8xi32>
    %89 = vector.shape_cast %88 : vector<8xi32> to vector<8x1xi32>
    %90 = vector.broadcast %89 : vector<8x1xi32> to vector<8x16xi32>
    %91 = arith.cmpi eq, %69, %90 : vector<8x16xi32>
    %cst_31 = arith.constant 0x7F800000 : f32
    %92 = vector.broadcast %cst_31 : f32 to vector<8x16xf32>
    %93 = arith.select %91, %92, %81 : vector<8x16xi1>, vector<8x16xf32>
    %cst_32 = arith.constant dense<0x7F800000> : vector<8xf32>
    %94 = vector.multi_reduction <minimumf>, %93, %cst_32 [1] : vector<8x16xf32> to vector<8xf32>
    %95 = vector.shape_cast %94 : vector<8xf32> to vector<8x1xf32>
    %96 = vector.broadcast %95 : vector<8x1xf32> to vector<8x16xf32>
    %97 = arith.cmpf oeq, %93, %96 : vector<8x16xf32>
    %c16_i32_33 = arith.constant 16 : i32
    %98 = vector.broadcast %c16_i32_33 : i32 to vector<8x16xi32>
    %99 = arith.select %97, %69, %98 : vector<8x16xi1>, vector<8x16xi32>
    %cst_34 = arith.constant dense<2147483647> : vector<8xi32>
    %100 = vector.multi_reduction <minsi>, %99, %cst_34 [1] : vector<8x16xi32> to vector<8xi32>
    %101 = vector.shape_cast %100 : vector<8xi32> to vector<8x1xi32>
    %102 = vector.broadcast %101 : vector<8x1xi32> to vector<8x16xi32>
    %103 = arith.cmpi eq, %69, %102 : vector<8x16xi32>
    %cst_35 = arith.constant 0x7F800000 : f32
    %104 = vector.broadcast %cst_35 : f32 to vector<8x16xf32>
    %105 = arith.select %103, %104, %93 : vector<8x16xi1>, vector<8x16xf32>
    %cst_36 = arith.constant dense<0x7F800000> : vector<8xf32>
    %106 = vector.multi_reduction <minimumf>, %105, %cst_36 [1] : vector<8x16xf32> to vector<8xf32>
    %107 = vector.shape_cast %106 : vector<8xf32> to vector<8x1xf32>
    %108 = vector.broadcast %107 : vector<8x1xf32> to vector<8x16xf32>
    %109 = arith.cmpf oeq, %105, %108 : vector<8x16xf32>
    %c16_i32_37 = arith.constant 16 : i32
    %110 = vector.broadcast %c16_i32_37 : i32 to vector<8x16xi32>
    %111 = arith.select %109, %69, %110 : vector<8x16xi1>, vector<8x16xi32>
    %cst_38 = arith.constant dense<2147483647> : vector<8xi32>
    %112 = vector.multi_reduction <minsi>, %111, %cst_38 [1] : vector<8x16xi32> to vector<8xi32>
    %113 = vector.shape_cast %112 : vector<8xi32> to vector<8x1xi32>
    %114 = tpu.concatenate %77, %89, %101, %113 in 1 : vector<8x1xi32>, vector<8x1xi32>, vector<8x1xi32>, vector<8x1xi32> -> vector<8x4xi32>
    %c0_39 = arith.constant 0 : index
    %c0_40 = arith.constant 0 : index
    %c0_41 = arith.constant 0 : index
    %115 = vector.load %arg11[%c0_39, %c0_40, %c0_41] : memref<1x8x4xi32, #tpu.memory_space<vmem>>, vector<1x8x4xi32>
    %116 = vector.shape_cast %115 : vector<1x8x4xi32> to vector<8x4xi32>
    %117 = vector.shape_cast %114 : vector<8x4xi32> to vector<1x8x4xi32>
    tpu.vector_store %arg11[%c0_39, %c0_40, %c0_41], %117 {strides = array<i32>} : memref<1x8x4xi32, #tpu.memory_space<vmem>>, vector<1x8x4xi32>,
    return
  }
  func.func @transform_0(%arg0: i32, %arg1: i32) -> (i32, i32, i32) {
    %c0_i32 = arith.constant 0 : i32
    %c0_i32_0 = arith.constant 0 : i32
    return %arg0, %arg1, %c0_i32 : i32, i32, i32
  }
  func.func @transform_1(%arg0: i32, %arg1: i32) -> (i32, i32, i32) {
    %c0_i32 = arith.constant 0 : i32
    %c0_i32_0 = arith.constant 0 : i32
    return %arg0, %arg1, %c0_i32 : i32, i32, i32
  }
  func.func @transform_2(%arg0: i32, %arg1: i32) -> (i32, i32, i32) {
    %c0_i32 = arith.constant 0 : i32
    %c0_i32_0 = arith.constant 0 : i32
    %c0_i32_1 = arith.constant 0 : i32
    return %arg0, %c0_i32, %c0_i32_0 : i32, i32, i32
  }
  func.func @transform_3(%arg0: i32, %arg1: i32) -> (i32, i32) {
    %c0_i32 = arith.constant 0 : i32
    %c0_i32_0 = arith.constant 0 : i32
    %c0_i32_1 = arith.constant 0 : i32
    return %c0_i32, %c0_i32_0 : i32, i32
  }
  func.func @transform_4(%arg0: i32, %arg1: i32) -> (i32, i32) {
    %c0_i32 = arith.constant 0 : i32
    %c0_i32_0 = arith.constant 0 : i32
    %c0_i32_1 = arith.constant 0 : i32
    return %c0_i32, %c0_i32_0 : i32, i32
  }
  func.func @transform_5(%arg0: i32, %arg1: i32) -> (i32, i32) {
    %c0_i32 = arith.constant 0 : i32
    %c0_i32_0 = arith.constant 0 : i32
    %c0_i32_1 = arith.constant 0 : i32
    return %c0_i32, %c0_i32_0 : i32, i32
  }
  func.func @transform_6(%arg0: i32, %arg1: i32) -> (i32, i32) {
    %c0_i32 = arith.constant 0 : i32
    %c0_i32_0 = arith.constant 0 : i32
    %c0_i32_1 = arith.constant 0 : i32
    return %c0_i32, %c0_i32_0 : i32, i32
  }
  func.func @transform_7(%arg0: i32, %arg1: i32) -> (i32, i32) {
    %c0_i32 = arith.constant 0 : i32
    %c0_i32_0 = arith.constant 0 : i32
    %c0_i32_1 = arith.constant 0 : i32
    return %c0_i32, %c0_i32_0 : i32, i32
  }
  func.func @transform_8(%arg0: i32, %arg1: i32) -> (i32, i32, i32) {
    %c0_i32 = arith.constant 0 : i32
    %c0_i32_0 = arith.constant 0 : i32
    return %arg0, %arg1, %c0_i32 : i32, i32, i32
  }
  func.func @transform_9(%arg0: i32, %arg1: i32) -> (i32, i32, i32) {
    %c0_i32 = arith.constant 0 : i32
    %c0_i32_0 = arith.constant 0 : i32
    return %arg0, %arg1, %c0_i32 : i32, i32, i32
  }
}

</mosaic_0001>

<bundles_post_ra>
// kernel: tpu_custom_call.1
= control target key start
LH: loop header
LB: loop body
LE: loop exit
PB: predicated region body
PF: predicated region fallthrough
CT: control target
= control target key end

     0   :  { %s1306_s0 = inlined_call_operand.vmem [shape: f32[2,16,8], index: 0, kind: input, shape index: {}]   ;;  %s1307_s1 = inlined_call_operand.vmem [shape: f32[2,16,3], index: 1, kind: input, shape index: {}]   ;;  %s1308_s2 = inlined_call_operand.vmem [shape: f32[2,3,16], index: 2, kind: input, shape index: {}]   ;;  %s1309_s3 = inlined_call_operand.vmem [shape: f32[8,48], index: 3, kind: input, shape index: {}]   ;;  %s1310_s4 = inlined_call_operand.vmem [shape: f32[3,32], index: 4, kind: input, shape index: {}]   ;;  %s1311_s5 = inlined_call_operand.vmem [shape: f32[1,32], index: 5, kind: input, shape index: {}]   ;;  %s1312_s6 = inlined_call_operand.vmem [shape: f32[32,16], index: 6, kind: input, shape index: {}]   ;;  %s1313_s7 = inlined_call_operand.vmem [shape: f32[1,16], index: 7, kind: input, shape index: {}]   ;;  %s1314_s8 = inlined_call_operand.hbm [shape: f32[2,16,32], index: 8, kind: output, shape index: {0}]   ;;  %s1315_s9 = inlined_call_operand.vmem [shape: s32[2,16,4], index: 9, kind: output, shape index: {1}]  }
   0x1   :  { %1317 = sst [smem:[#allocation6_spill]] %s1306_s0 }
   0x2   :  { %1318 = sst [smem:[#allocation7_spill]] %s1307_s1 }
   0x3   :  { %1319 = sst [smem:[#allocation8_spill]] %s1308_s2 }
   0x4   :  { %1320 = sst [smem:[#allocation9_spill]] %s1309_s3 }
   0x5   :  { %15 = vsyncpa [#allocation3], 0 }
   0x6   :  { %17 = vsyncpa [#allocation3 + $0x1], 0  ;;  %s1112_s30 = smov 0   ;;  %s1114_s10 = smov 0  }
   0x7   :  { %s1116_s11 = smov 0   ;;  %s1118_s12 = smov 0  }
   0x8   :  { %s1120_s13 = smov 0   ;;  %s1122_s14 = smov 0  }
   0x9   :  { %s1124_s15 = smov 0   ;;  %s1126_s16 = smov 0  }
   0xa LB: > { %s852_s17 = sadd.s32 4294967295, %s1053_s16   ;;  %s853_s18 = sadd.s32 4294967294, %s1053_s16   ;;  %s1053_s16 = sphi %s1126_s16, %s23_s16   ;;  %s1049_s15 = sphi %s1124_s15, %s1335_s15   ;;  %s1045_s14 = sphi %s1122_s14, %s1334_s14   ;;  %s1041_s13 = sphi %s1120_s13, %s1333_s13   ;;  %s1037_s12 = sphi %s1118_s12, %s1332_s12   ;;  %s1033_s11 = sphi %s1116_s11, %s1331_s11   ;;  %s1029_s10 = sphi %s1114_s10, %s1330_s10   ;;  %s1025_s30 = sphi %s1112_s30, %s1329_s30  }
   0xb   : > { %s32_s19 = sadd.s32 1, %s1045_s14  ;;  %s35_s20 = sadd.s32 1, %s1049_s15 }
   0xc   : > { %p33_p0 = scmp.ge.s32.totalorder %s32_s19, 2  ;;  %p241_p1 = scmp.ne.s32.totalorder %s1033_s11, %s1029_s10 }
   0xd   : > { %p242_p2 = scmp.eq.s32.totalorder %s852_s17, 3  ;;  %p247_p5 = scmp.ne.s32.totalorder %s1029_s10, %s1025_s30 }
   0xe   : > { %s1337_s19 = smov (%p33_p0, %s32_s19), 0  ;;  %s1339_s20 = smov (!%p33_p0, %s35_s20), %s1049_s15 }
   0xf   : > { %s227_s21 = ssub.s32 %s1045_s14, %s1337_s19  ;;  %p1163_p3 = por %p242_p2, %p241_p1 }
  0x10   : > { %p37_p4 = scmp.ge.s32.totalorder %s1339_s20, 2  ;;  %p248_p6 = scmp.eq.s32.totalorder %s853_s18, 3 }
  0x11   : > { %p856_p7 = scmp.ge.s32.totalorder %s1053_s16, 1  ;;  %p338_p9 = scmp.lt.s32.totalorder %s1053_s16, 5 }
  0x12   : > { %s1341_s20 = smov (%p37_p4, %s1339_s20), 0  ;;  %p1172_p8 = por %p248_p6, %p247_p5 }
  0x13   : > { %1322 = sst [smem:[#allocation5_spill]] %s1341_s20  ;;  %s226_s24 = ssub.s32 %s1049_s15, %s1341_s20 }
  0x14   : > { %s231_s25 = sadd.s32 1, %s1033_s11  ;;  %s228_s26 = sor.u32 %s227_s21, %s226_s24 }
  0x15   : > { %p339_p10 = pnand %p856_p7, %p338_p9  ;;  %p229_p11 = scmp.eq.s32.totalorder %s228_s26, 0 }
  0x16   : > { %p397_p12 = scmp.lt.s32.totalorder (!%p339_p10), %s1041_s13, 1  ;;  %p399_p13 = scmp.lt.s32.totalorder (!%p339_p10), %s1037_s12, 1 }
  0x17   : > { %s1181_s27 = scalar_select %p229_p11, %s1033_s11, %s231_s25  }
  0x18   : > { %342 = sbr.rel (%p339_p10) target bundleno = 1731 (0x6c3), region = 52  ;;  %s1324_s1 = sld [smem:[#allocation7_spill]] (!%p339_p10) }
  0x19   : > { %s1057_s20 = smov (!%p339_p10), 127   ;;  %s1325_s2 = sld [smem:[#allocation8_spill]] (!%p339_p10) }
  0x1a   : > { %s1326_s0 = sld [smem:[#allocation6_spill]] (!%p339_p10) }
  0x1b   : > { %s1327_s3 = sld [smem:[#allocation9_spill]] (!%p339_p10) }
  0x1d   : > { %v1055_v0 = vmov 0   ;;  %v1056_v1 = vmov 2   ;;  %s398_s28 = scalar_select %p397_p12, %s1041_s13, 1  ;;  %v1058_v4 = vmov 1   ;;  %vm534_vm0 = vcmask 130048  }
  0x1e   : > { %952 = vset.pattern.permute.xlu1 %v1055_v0  ;;  %954 = vset.pattern.permute.xlu2 %v1056_v1  ;;  %s400_s29 = scalar_select %p399_p13, %s1037_s12, 1  ;;  %v584_v32 = vlaneseq  ;;  %vm462_vm8 = vcmask 1042432   ;;  %vm458_vm9 = vcmask 23552   ;;  %vm429_vm10 = vcmask 64512  }
  0x1f   : > { %956 = vset.pattern.permute.xlu0 %v1055_v0  ;;  %s858_s17 = sshll.u32 %s398_s28, 1  ;;  %vm495_vm12 = vcmask 261120   ;;  %vm672_vm13 = vcmask 7168   ;;  %vm674_vm14 = vcmask 15360  }
  0x20   : > { %s402_s18 = sadd.s32 %s858_s17, %s400_s29  ;;  %s1059_s29 = smov 126   ;;  %v1204_v33 = vand.u32 127, %v584_v32  ;;  %v958_v32 = vld [vmem:[%s1313_s7] ss:$0 sm:$0xff] }
  0x21   : > { %s1187_s21 = sshll.u32 %s402_s18, 3  ;;  %s862_s17 = sshll.u32 %s398_s28, 2 }
  0x22   : > { %s412_s26 = scalar_lea.vmem %s1324_s1, %s1187_s21  ;;  %s416_s25 = scalar_lea.vmem %s1325_s2, %s862_s17 }
  0x23   : > { %v1193_v2 = vld [vmem:[%s412_s26] sm:$0xff]  ;;  %s404_s26 = scalar_lea.vmem %s1326_s0, %s1187_s21  ;;  %s1060_s0 = smov 112  }
  0x24   : > { %v565_v3 = vmul.f32 %v1193_v2, %v1193_v2  ;;  %538 = vperm.xlu1 %952, %v1193_v2   ;;  %551 = vperm.xlu2 %954, %v1193_v2   ;;  %v427_v10 = vld [vmem:[%s416_s25] sm:$0x7]  ;;  %s870_s17 = sshll.u32 %s1041_s13, 1  ;;  %s384_s18 = sand.u32 1, %s1029_s10  }
  0x25   : > { %v541_v11 = vperm.slane %v427_v10, 0  ;;  %v557_v12 = vmul.f32 %v427_v10, %v427_v10  ;;  %v547_v13 = vperm.slane %v427_v10, 1  ;;  %v554_v17 = vperm.slane %v427_v10, 2  ;;  %v425_v10 = vld [vmem:[%s404_s26] sm:$0xff]  ;;  %s424_s26 = scalar_lea.vmem %s1315_s9, %s1187_s21  ;;  %s698_s24 = sadd.s32 %s1037_s12, %s870_s17 }
  0x26   : > { %567 = vrot.lane.b32.xlu0 %v565_v3, %s1057_s20  ;;  %s1061_s20 = smov 32   ;;  %s857_s1 = sshll.u32 %s384_s18, 3 }
  0x27   : > { %v559_v18 = vrot.slane %v557_v12, 1  ;;  %v562_v23 = vrot.slane %v557_v12, 2  ;;  %s871_s25 = sshll.u32 %s698_s24, 3  ;;  %s680_s12 = scalar_lea.sflag [#allocation3], %s384_s18 }
  0x28   : > { %s700_s2 = scalar_lea.hbm %s1314_s8, %s871_s25 }
  0x29   : > { %v561_v22 = vadd.f32 %v559_v18, %v557_v12  ;;  %s704_s21 = sshll.u32 %s700_s2, 4  ;;  %s979_s2 = scalar_lea.hbm %s1314_s8, 32  ;;  %s705_s21 = int_to_ptr.hbm [resolvable:$true] %s704_s21 }
  0x2a   : > { %s973_s13 = sshra.s32 %s705_s21, 4  ;;  %s974_s13 = int_to_ptr.hbm [resolvable:$true] %s973_s13 }
  0x2b   : > { %v564_v25 = vadd.f32 %v562_v23, %v561_v22  ;;  %p980_p4 = scmp.lt.s32.totalorder %s974_s13, %s1314_s8 }
  0x2c   : > { %953 = vset.pattern.permute.xlu1 %v1058_v4  ;;  %955 = vset.pattern.permute.xlu2 %v1055_v0 }
  0x2d   : > { %544 = vperm.xlu1 %953, %v1193_v2   ;;  %v582_v27 = vperm.slane %v564_v25, 0 }
  0x2e   : > { %571 = vrot.lane.b32.xlu0 %v565_v3, %s1059_s29  ;;  %s975_s29 = scalar_lea.hbm %s974_s13, 8 }
  0x2f   : > { %p976_p0 = scmp.ne.s32.totalorder %s974_s13, %s975_s29  ;;  %p981_p5 = scmp.lt.s32.totalorder %s979_s2, %s975_s29 }
  0x31   : > { %p977_p1 = pnand %p976_p0, %p1163_p3  ;;  %p982_p6 = por %p981_p5, %p980_p4 }
  0x33   : > { %p978_p2 = pneg %p977_p1 }
  0x35   : > { %p983_p7 = pnand %p982_p6, %p978_p2 }
  0x7e   : > { %v552_v19 = vpop.permute.xlu2 %551 }
  0x7f   : > { %v555_v21 = vmul.f32 %v554_v17, %v552_v19  ;;  %v488_v17 = vld [vmem:[%s1312_s6 + $0x8] sm:$0xff]  ;;  %v487_v19 = vld [vmem:[%s1312_s6] sm:$0xff] }
  0x96   : > { %v539_v9 = vpop.permute.xlu1 %538 }
  0x97   : > { %v542_v15 = vmul.f32 %v541_v11, %v539_v9  ;;  %v428_v9 = vld [vmem:[%s1327_s3] sm:$0xff]  ;;  %s386_s3 = scalar_lea.vmem [#allocation2], %s857_s1 }
  0x98   : > { %v568_v5 = vpop.permute.xlu0 %567  ;;  %448 = vmatpush.msra.mxu0 %v428_v9  ;;  %s702_s28 = sshll.u32 %s386_s3, 4  ;;  %s703_s28 = int_to_ptr.vmem [resolvable:$true] %s702_s28 }
  0x99   : > { %v570_v6 = vadd.f32 %v568_v5, %v565_v3  ;;  %865 = vmatmul.msk.f32.vlgmr.msra.gmra.mxu0 %vm429_vm10, %v425_v10 }
  0x9f   : > { %v545_v14 = vpop.permute.xlu1 %544 }
  0xa0   : > { %v572_v7 = vpop.permute.xlu0 %571  ;;  %v548_v16 = vmul.f32 %v547_v13, %v545_v14 }
  0xa1   : > { %v574_v8 = vadd.f32 %v572_v7, %v570_v6 }
  0xa2   : > { %v549_v20 = vadd.f32 %v548_v16, %v542_v15  ;;  %v490_v15 = vld [vmem:[%s1312_s6 + $0x18] sm:$0xff]  ;;  %v489_v16 = vld [vmem:[%s1312_s6 + $0x10] sm:$0xff] }
  0xa3   : > { %578 = vperm.xlu2 %955, %v574_v8   ;;  %v453_v8 = vld [vmem:[%s1310_s4] sm:$0x7]  ;;  %511 = vmatpush.msra.mxu2 %v490_v15 }
  0xa4   : > { %v556_v24 = vadd.f32 %v555_v21, %v549_v20  ;;  %866 = vmatpush.msk.msra.mxu1 %vm462_vm8, %v453_v8 }
  0xa5   : > { %867 = vmatmul.msk.f32.vlgmr.msra.gmra.mxu1 %vm458_vm9, %v1193_v2  ;;  %v957_v2 = vld [vmem:[%s1311_s5] ss:$0 sm:$0xff]  ;;  %512 = vmatpush.msra.mxu2 %v489_v16 }
  0xa6   : > { %v575_v26 = vmul.f32 -2.0, %v556_v24 }
  0xa7   : > { %513 = vmatpush.msra.mxu2 %v488_v17 }
  0xa9   : > { %514 = vmatpush.msra.mxu2 %v487_v19 }
  0xfd   : > { %v579_v28 = vpop.permute.xlu2 %578 }
  0xfe   : > { %v581_v29 = vadd.f32 %v579_v28, %v575_v26 }
 0x100   : > { %v583_v30 = vadd.f32 %v582_v27, %v581_v29 }
 0x102   : > { %v586_v31 = vsel %vm534_vm0, %v583_v30, inf }
 0x103   : > { %587 = vmin.xlane.f32.xlu0 %v586_v31 }
 0x116   : > { %v450_v31 = vpop.f32.mrf.mxu0 }
 0x122   : > { %v483_v18 = vpop.f32.mrf.mxu1 }
 0x123   : > { %v484_v20 = vadd.f32 %v957_v2, %v483_v18 }
 0x125   : > { %v486_v21 = vmax.f32 %v484_v20, 0.0 }
 0x127   : > { %868 = vmatmul.msk.f32.vlgmr.msra.gmra.mxu2 %vm495_vm12, %v486_v21 }
 0x176   : > { %v588_v34 = vpop.xlane.xlu0 %587 }
 0x177   : > { %vm589_vm1 = vcmp.eq.f32.partialorder %v583_v30, %v588_v34 }
 0x178   : > { %v590_v35 = vsel %vm589_vm1, %v1204_v33, 16 }
 0x179   : > { %v591_v36 = vsel %vm534_vm0, %v590_v35, 2147483647 }
 0x17a   : > { %v593_v37 = vshra.s32 %v591_v36, 16  ;;  %v592_v39 = vand.u32 65535, %v591_v36 }
 0x17c   : > { %v595_v38 = vcvt.s32.f32 %v593_v37  ;;  %v594_v41 = vcvt.s32.f32 %v592_v39 }
 0x17e   : > { %596 = vmin.xlane.f32.xlu1 %v595_v38 }
 0x1aa   : > { %v516_v34 = vpop.f32.mrf.mxu2 }
 0x1ab   : > { %v517_v35 = vadd.f32 %v958_v32, %v516_v34 }
 0x1f1   : > { %v597_v40 = vpop.xlane.xlu1 %596 }
 0x1f2   : > { %vm598_vm2 = vcmp.eq.f32.partialorder %v595_v38, %v597_v40  ;;  %v603_v43 = vcvt.f32.s32 %v597_v40 }
 0x1f3   : > { %v599_v42 = vsel %vm598_vm2, %v594_v41, inf }
 0x1f4   : > { %600 = vmin.xlane.f32.xlu2 %v599_v42  ;;  %v604_v45 = vshll.u32 %v603_v43, 16 }
 0x267   : > { %v601_v44 = vpop.xlane.xlu2 %600 }
 0x268   : > { %v602_v46 = vcvt.f32.s32 %v601_v44 }
 0x26a   : > { %v1208_v47 = vadd.s32 %v604_v45, %v602_v46 }
 0x26c   : > { %vm606_vm3 = vcmp.eq.s32.totalorder %v1204_v33, %v1208_v47 }
 0x26d   : > { %v607_v48 = vsel %vm606_vm3, inf, %v583_v30  ;;  %vm677_vm3 = vcmask 31744  }
 0x26e   : > { %v608_v49 = vsel %vm534_vm0, %v607_v48, inf }
 0x26f   : > { %609 = vmin.xlane.f32.xlu2 %v608_v49 }
 0x2e2   : > { %v610_v50 = vpop.xlane.xlu2 %609 }
 0x2e3   : > { %vm611_vm4 = vcmp.eq.f32.partialorder %v607_v48, %v610_v50 }
 0x2e4   : > { %v612_v51 = vsel %vm611_vm4, %v1204_v33, 16 }
 0x2e5   : > { %v613_v52 = vsel %vm534_vm0, %v612_v51, 2147483647 }
 0x2e6   : > { %v615_v53 = vshra.s32 %v613_v52, 16  ;;  %v614_v55 = vand.u32 65535, %v613_v52 }
 0x2e8   : > { %v617_v54 = vcvt.s32.f32 %v615_v53  ;;  %v616_v57 = vcvt.s32.f32 %v614_v55 }
 0x2ea   : > { %618 = vmin.xlane.f32.xlu0 %v617_v54 }
 0x35d   : > { %v619_v56 = vpop.xlane.xlu0 %618 }
 0x35e   : > { %vm620_vm5 = vcmp.eq.f32.partialorder %v617_v54, %v619_v56  ;;  %v625_v59 = vcvt.f32.s32 %v619_v56 }
 0x35f   : > { %v621_v58 = vsel %vm620_vm5, %v616_v57, inf }
 0x360   : > { %622 = vmin.xlane.f32.xlu1 %v621_v58  ;;  %v626_v61 = vshll.u32 %v625_v59, 16 }
 0x3d3   : > { %v623_v60 = vpop.xlane.xlu1 %622 }
 0x3d4   : > { %v624_v62 = vcvt.f32.s32 %v623_v60 }
 0x3d6   : > { %v627_v63 = vadd.s32 %v626_v61, %v624_v62 }
 0x3d8   : > { %vm628_vm6 = vcmp.eq.s32.totalorder %v1204_v33, %v627_v63  ;;  %v673_v27 = vsel %vm672_vm13, %v1208_v47, %v627_v63 }
 0x3d9   : > { %v629_v0 = vsel %vm628_vm6, inf, %v607_v48 }
 0x3da   : > { %v630_v1 = vsel %vm534_vm0, %v629_v0, inf }
 0x3db   : > { %631 = vmin.xlane.f32.xlu2 %v630_v1 }
 0x44e   : > { %v632_v3 = vpop.xlane.xlu2 %631 }
 0x44f   : > { %vm633_vm7 = vcmp.eq.f32.partialorder %v629_v0, %v632_v3 }
 0x450   : > { %v634_v4 = vsel %vm633_vm7, %v1204_v33, 16 }
 0x451   : > { %v635_v5 = vsel %vm534_vm0, %v634_v4, 2147483647 }
 0x452   : > { %v637_v6 = vshra.s32 %v635_v5, 16  ;;  %v636_v11 = vand.u32 65535, %v635_v5 }
 0x454   : > { %v639_v7 = vcvt.s32.f32 %v637_v6  ;;  %v638_v13 = vcvt.s32.f32 %v636_v11 }
 0x456   : > { %640 = vmin.xlane.f32.xlu0 %v639_v7 }
 0x4c9   : > { %v641_v12 = vpop.xlane.xlu0 %640 }
 0x4ca   : > { %vm642_vm11 = vcmp.eq.f32.partialorder %v639_v7, %v641_v12  ;;  %v647_v22 = vcvt.f32.s32 %v641_v12 }
 0x4cb   : > { %v643_v14 = vsel %vm642_vm11, %v638_v13, inf }
 0x4cc   : > { %644 = vmin.xlane.f32.xlu1 %v643_v14  ;;  %v648_v24 = vshll.u32 %v647_v22, 16 }
 0x4e5   : > { %526 = vrot.lane.b32.xlu1 %v517_v35, %s1061_s20 }
 0x53f   : > { %v645_v23 = vpop.xlane.xlu1 %644 }
 0x540   : > { %v646_v25 = vcvt.f32.s32 %v645_v23 }
 0x542   : > { %v649_v26 = vadd.s32 %v648_v24, %v646_v25 }
 0x544   : > { %v675_v28 = vsel %vm674_vm14, %v673_v27, %v649_v26  ;;  %vm650_vm15 = vcmp.eq.s32.totalorder %v1204_v33, %v649_v26 }
 0x545   : > { %v651_v29 = vsel %vm650_vm15, inf, %v629_v0 }
 0x546   : > { %v652_v30 = vsel %vm534_vm0, %v651_v29, inf }
 0x547   : > { %653 = vmin.xlane.f32.xlu2 %v652_v30 }
 0x557   : > { %v527_v45 = vpop.permute.xlu1 %526 }
 0x558   : > { %v529_v46 = vadd.f32 %v527_v45, %v450_v31 }
 0x55f   : > { %520 = vrot.lane.b32.xlu2 %v450_v31, %s1060_s0 }
 0x5ba   : > { %v654_v36 = vpop.xlane.xlu2 %653 }
 0x5bb   : > { %vm655_vm1 = vcmp.eq.f32.partialorder %v651_v29, %v654_v36 }
 0x5bc   : > { %v656_v37 = vsel %vm655_vm1, %v1204_v33, 16 }
 0x5bd   : > { %v657_v38 = vsel %vm534_vm0, %v656_v37, 2147483647 }
 0x5be   : > { %v659_v39 = vshra.s32 %v657_v38, 16  ;;  %v658_v41 = vand.u32 65535, %v657_v38 }
 0x5c0   : > { %v661_v40 = vcvt.s32.f32 %v659_v39  ;;  %v660_v43 = vcvt.s32.f32 %v658_v41 }
 0x5c2   : > { %662 = vmin.xlane.f32.xlu0 %v661_v40  ;;  %v521_v52 = vpop.permute.xlu2 %520 }
 0x5c3   : > { %v523_v53 = vsub.f32 %v450_v31, %v521_v52 }
 0x5c5   : > { %v524_v54 = vadd.f32 %v523_v53, %v517_v35 }
 0x635   : > { %v663_v42 = vpop.xlane.xlu0 %662 }
 0x636   : > { %vm664_vm2 = vcmp.eq.f32.partialorder %v661_v40, %v663_v42  ;;  %v669_v47 = vcvt.f32.s32 %v663_v42 }
 0x637   : > { %v665_v44 = vsel %vm664_vm2, %v660_v43, inf }
 0x638   : > { %666 = vmin.xlane.f32.xlu0 %v665_v44  ;;  %v670_v48 = vshll.u32 %v669_v47, 16 }
 0x64c   : > { %531 = vrot.lane.b32.xlu0 %v529_v46, %s1060_s0 }
 0x6ab   : > { %v667_v33 = vpop.xlane.xlu0 %666 }
 0x6ac   : > { %v668_v49 = vcvt.f32.s32 %v667_v33 }
 0x6ae   : > { %v671_v50 = vadd.s32 %v670_v48, %v668_v49 }
 0x6b0   : > { %v676_v51 = vsel %vm458_vm9, %v675_v28, %v671_v50 }
 0x6b1   : > { %678 = vst.msk [vmem:[%s424_s26] sm:$0xff] %vm677_vm3, %v676_v51 }
 0x6be   : > { %v532_v55 = vpop.permute.xlu0 %531 }
 0x6bf   : > { %v535_v56 = vsel %vm534_vm0, %v524_v54, %v532_v55 }
 0x6c0   : > { %536 = vst.msk [vmem:[%s386_s3] sm:$0xff] %vm495_vm12, %v535_v56 }
 0x6c1   : > { %986 = shalt.err (!%p983_p7)
}
 0x6c2   : > { %874 = dma.vmem_to_hbm [thread:$0]  (%p1163_p3), %s703_s28, 128, %s705_s21, %s680_s12  }
 0x6c3 PF: > { %p880_p9 = scmp.ge.s32.totalorder %s1053_s16, 2  ;;  %s719_s3 = sand.u32 1, %s1025_s30  }
 0x6c4   : > { %s720_s18 = scalar_lea.sflag [#allocation3], %s719_s3 }
 0x6c5   : > { %p877_p10 = pnand %p880_p9, %p1172_p8 }
 0x6c7   : > { %p878_p11 = pneg %p877_p10 }
 0x6c9   : > { %1020 = dma.done.wait (%p878_p11), %s720_s18, 128  }
 0x6ca   : > { %1022 = vsyncadd (%p878_p11), %s720_s18, 4294967168  ;;  %s23_s16 = sadd.s32 1, %s1053_s16   ;;  %s1328_s22 = sld [smem:[#allocation5_spill]] }
 0x6cb   : > { %p20_p12 = scmp.ge.s32.totalorder %s23_s16, 6   ;;  %s1329_s30 = smov %s1029_s10 }
 0x6cc   : > { %s1330_s10 = smov %s1033_s11  ;;  %s1331_s11 = smov %s1181_s27 }
 0x6cd   : > { %s1332_s12 = smov %s1045_s14  ;;  %s1333_s13 = smov %s1049_s15 }
 0x6ce   : > { %s1334_s14 = smov %s1337_s19  ;;  %22 = sbr.rel (!%p20_p12) target bundleno = 10 (0xa), region = 105 }
 0x6d0   : > { %s1335_s15 = smov %s1328_s22 }
 0x6d3   :  { %737 = vsyncpa [#allocation3], 1 }
 0x6d4   :  { %739 = vsyncpa [#allocation3 + $0x1], 1 }

</bundles_post_ra>
